<compile_context>
chip_gen: v5e
topology: v5e:2x2
jax: 0.10.0
libtpu: 0.0.40
codegen_flags: <defaults>
</compile_context>

<pallas_src>
import numpy as np
import jax
import jax.numpy as jnp
from jax.experimental import pallas as pl
from jax.experimental.pallas import tpu as pltpu


BN_EPS = 1e-5


# ---------------------------------------------------------------------------
# Fused encoder kernel: one grid step per batch element
# ---------------------------------------------------------------------------
def _encoder_kernel(p1_ref, w1_ref, g2_ref, w2_ref, g3_ref, w3_ref, wh_ref,
                    pp_ref, eps_ref, out_ref, p2_s, p3_s, fh_s):
    f32 = jnp.float32
    bf16 = jnp.bfloat16

    C1 = w1_ref.shape[1]
    C2 = w2_ref.shape[1]
    C3 = w3_ref.shape[1]
    O2 = g2_ref.shape[0] // 9
    O3 = g3_ref.shape[0] // 9
    L = eps_ref.shape[-1]

    # Packed per-channel params (conv bias + inference BN folded) + head bias.
    scale1 = pp_ref[0:1, 0:C1]
    shift1 = pp_ref[1:2, 0:C1]
    scale2 = pp_ref[2:3, 0:C2]
    shift2 = pp_ref[3:4, 0:C2]
    scale3 = pp_ref[4:5, 0:C3]
    shift3 = pp_ref[5:6, 0:C3]
    bh = pp_ref[6:7, 0:2 * L]

    # ---- conv1 + BN + ReLU: one GEMM over wrapper-built im2col patches -----
    a1 = jnp.dot(p1_ref[...], w1_ref[...], preferred_element_type=f32)
    a1 = jnp.maximum(a1 * scale1 + shift1, 0.0)                   # [Q1, C1] f32

    # ---- conv2: batch-independent gather (1 dot) -> lane-packed patches ----
    #      -> single GEMM with K = 9*C1 (+ BN + ReLU)
    g2 = jnp.dot(g2_ref[...], a1.astype(bf16), preferred_element_type=f32)
    for t in range(9):
        p2_s[:, t * C1:(t + 1) * C1] = g2[t * O2:(t + 1) * O2, :]
    a2 = jnp.dot(p2_s[...].astype(bf16), w2_ref[...], preferred_element_type=f32)
    a2 = jnp.maximum(a2 * scale2 + shift2, 0.0)                   # [O2, C2] f32

    # ---- conv3: same pattern, K = 9*C2 --------------------------------------
    g3 = jnp.dot(g3_ref[...], a2.astype(bf16), preferred_element_type=f32)
    for t in range(9):
        p3_s[:, t * C2:(t + 1) * C2] = g3[t * O3:(t + 1) * O3, :]
    a3 = jnp.dot(p3_s[...].astype(bf16), w3_ref[...], preferred_element_type=f32)
    a3 = jnp.maximum(a3 * scale3 + shift3, 0.0)                   # [O3, C3] f32

    # ---- Flatten (spatial-major; head weights pre-permuted to match torch's
    #      NCHW flatten) + packed mean|log_var heads: one K = O3*C3 GEMM -------
    for s in range(O3):
        fh_s[:, s * C3:(s + 1) * C3] = a3[s:s + 1, :]
    mv = jnp.dot(fh_s[...].astype(bf16), wh_ref[...],
                 preferred_element_type=f32) + bh                 # [1, 2L]

    # ---- Reparameterization --------------------------------------------------
    z = mv[:, 0:L] + jnp.exp(0.5 * mv[:, L:2 * L]) * eps_ref[...]

    out_ref[:, 0:2 * L] = mv                                      # mean | log_var
    out_ref[:, 2 * L:3 * L] = z


# ---------------------------------------------------------------------------
# Wrapper-side layout plumbing (trace-time, batch-independent constants)
# ---------------------------------------------------------------------------
def _im2col_stride2(x):
    """[B, C, H, W] -> [B, OH*OW, C*9] patches for 3x3 / stride-2 / pad-1 conv.
    Column order: c*9 + kh*3 + kw."""
    B, C, H, W = x.shape
    OH, OW = H // 2, W // 2
    xp = jnp.pad(x, ((0, 0), (0, 0), (1, 1), (1, 1)))
    cols = []
    for kh in range(3):
        for kw in range(3):
            cols.append(xp[:, :, kh:kh + 2 * OH:2, kw:kw + 2 * OW:2])  # [B,C,OH,OW]
    p = jnp.stack(cols, axis=2)               # [B, C, 9, OH, OW]
    p = p.transpose(0, 3, 4, 1, 2)            # [B, OH, OW, C, 9]
    return p.reshape(B, OH * OW, C * 9)


def _gather_matrix(IH, IW):
    """Batch-independent 0/1 gather G [9*OH*OW, IH*IW]:
    (G @ act)[t*O + o, :] = act[src(o, t), :] (zero at padding) for 3x3/s2/p1."""
    OH, OW = IH // 2, IW // 2
    G = np.zeros((9 * OH * OW, IH * IW), np.float32)
    for kh in range(3):
        for kw in range(3):
            t = kh * 3 + kw
            for i in range(OH):
                for j in range(OW):
                    ih, iw = 2 * i + kh - 1, 2 * j + kw - 1
                    if 0 <= ih < IH and 0 <= iw < IW:
                        G[t * OH * OW + i * OW + j, ih * IW + iw] = 1.0
    return G


def _fold_bn(conv_b, gamma, beta, mean, var):
    """Fold conv bias + inference-mode BatchNorm into per-channel scale/shift."""
    scale = gamma / jnp.sqrt(var + BN_EPS)
    shift = beta + (conv_b - mean) * scale
    return scale, shift


def encoder_pallas(x, params, eps):
    """Fused Pallas encoder forward. Returns (z_mean, z_log_var, z)."""
    B, C, H, W = x.shape
    latent = params["wm"].shape[1]
    C1, C2, C3 = params["w1"].shape[0], params["w2"].shape[0], params["w3"].shape[0]
    OH1, OW1 = H // 2, W // 2
    OH2, OW2 = OH1 // 2, OW1 // 2
    OH3, OW3 = OH2 // 2, OW2 // 2
    Q1, O2, O3 = OH1 * OW1, OH2 * OW2, OH3 * OW3
    bf16 = jnp.bfloat16

    # conv1: im2col patches (only wrapper data-movement on an actual input)
    patches1 = _im2col_stride2(x).astype(bf16)                     # [B, Q1, C*9]
    w1g = params["w1"].transpose(1, 2, 3, 0).reshape(C * 9, C1).astype(bf16)

    # conv2 / conv3: batch-independent gathers + tap-packed conv weights
    gm2 = jnp.asarray(_gather_matrix(OH1, OW1), bf16)              # [9*O2, Q1]
    w2g = params["w2"].transpose(2, 3, 1, 0).reshape(9 * C1, C2).astype(bf16)
    gm3 = jnp.asarray(_gather_matrix(OH2, OW2), bf16)              # [9*O3, O2]
    w3g = params["w3"].transpose(2, 3, 1, 0).reshape(9 * C2, C3).astype(bf16)

    # packed latent heads, permuted so in-kernel spatial-major flatten matches
    # torch's NCHW (channel-major) flatten
    def head_perm(w):                                              # [C3*O3, L] -> [O3*C3, L]
        return w.reshape(C3, O3, -1).transpose(1, 0, 2).reshape(O3 * C3, -1)
    wh = jnp.concatenate([head_perm(params["wm"]), head_perm(params["wv"])],
                         axis=1).astype(bf16)                      # [O3*C3, 2L]

    # fold BN + conv bias; coalesce all tiny params into one [8,128] slab
    s1, t1 = _fold_bn(params["b1"], params["g1"], params["be1"], params["m1"], params["v1"])
    s2, t2 = _fold_bn(params["b2"], params["g2"], params["be2"], params["m2"], params["v2"])
    s3, t3 = _fold_bn(params["b3"], params["g3"], params["be3"], params["m3"], params["v3"])
    bh = jnp.concatenate([params["bm"], params["bv"]], axis=0)
    pp = jnp.zeros((8, 128), jnp.float32)
    pp = pp.at[0, :C1].set(s1).at[1, :C1].set(t1)
    pp = pp.at[2, :C2].set(s2).at[3, :C2].set(t2)
    pp = pp.at[4, :C3].set(s3).at[5, :C3].set(t3)
    pp = pp.at[6, :2 * latent].set(bh)

    eps3 = eps.reshape(B, 1, latent).astype(jnp.float32)

    inputs = (patches1, w1g, gm2, w2g, gm3, w3g, wh, pp, eps3)

    in_specs = [
        pl.BlockSpec((None, Q1, C * 9), lambda b: (b, 0, 0)),      # per-batch patches
        pl.BlockSpec(w1g.shape, lambda b: (0, 0)),                 # resident weights
        pl.BlockSpec(gm2.shape, lambda b: (0, 0)),
        pl.BlockSpec(w2g.shape, lambda b: (0, 0)),
        pl.BlockSpec(gm3.shape, lambda b: (0, 0)),
        pl.BlockSpec(w3g.shape, lambda b: (0, 0)),
        pl.BlockSpec(wh.shape, lambda b: (0, 0)),
        pl.BlockSpec(pp.shape, lambda b: (0, 0)),
        pl.BlockSpec((None, 1, latent), lambda b: (b, 0, 0)),
    ]
    out_specs = pl.BlockSpec((None, 1, 3 * latent), lambda b: (b, 0, 0))

    flops_per_b = 2 * (Q1 * (C * 9) * C1
                       + (9 * O2) * Q1 * C1 + O2 * (9 * C1) * C2
                       + (9 * O3) * O2 * C2 + O3 * (9 * C2) * C3
                       + (O3 * C3) * (2 * latent))
    bytes_accessed = sum(int(np.prod(a.shape)) * a.dtype.itemsize for a in inputs) \
        + B * 3 * latent * 4

    out = pl.pallas_call(
        _encoder_kernel,
        out_shape=jax.ShapeDtypeStruct((B, 1, 3 * latent), jnp.float32),
        grid=(B,),
        in_specs=in_specs,
        out_specs=out_specs,
        scratch_shapes=[pltpu.VMEM((O2, 9 * C1), jnp.float32),     # conv2 patches
                        pltpu.VMEM((O3, 9 * C2), jnp.float32),     # conv3 patches
                        pltpu.VMEM((1, O3 * C3), jnp.float32)],    # flattened features
        compiler_params=pltpu.CompilerParams(
            dimension_semantics=("parallel",),
            vmem_limit_bytes=32 * 1024 * 1024),
        cost_estimate=pl.CostEstimate(flops=int(B * flops_per_b),
                                      transcendentals=int(B * latent),
                                      bytes_accessed=int(bytes_accessed)),
    )(*inputs)

    out = out[:, 0, :]
    return out[:, 0:latent], out[:, latent:2 * latent], out[:, 2 * latent:3 * latent]


# ---------------------------------------------------------------------------
# Parameter init (mirrors the PyTorch module's tensor layouts)
# ---------------------------------------------------------------------------
def init_params(key, latent_dim, input_size):
    in_dim = 64 * (input_size // 8) * (input_size // 8)
    keys = iter(jax.random.split(key, 22))
    p = {}

    def conv_block(idx, cin, cout):
        p[f"w{idx}"] = 0.1 * jax.random.normal(next(keys), (cout, cin, 3, 3), jnp.float32)
        p[f"b{idx}"] = 0.05 * jax.random.normal(next(keys), (cout,), jnp.float32)
        p[f"g{idx}"] = 1.0 + 0.1 * jax.random.normal(next(keys), (cout,), jnp.float32)
        p[f"be{idx}"] = 0.05 * jax.random.normal(next(keys), (cout,), jnp.float32)
        p[f"m{idx}"] = 0.05 * jax.random.normal(next(keys), (cout,), jnp.float32)
        p[f"v{idx}"] = jax.random.uniform(next(keys), (cout,), jnp.float32, 0.5, 1.5)

    conv_block(1, 3, 16)
    conv_block(2, 16, 32)
    conv_block(3, 32, 64)
    p["wm"] = 0.05 * jax.random.normal(next(keys), (in_dim, latent_dim), jnp.float32)
    p["bm"] = 0.02 * jax.random.normal(next(keys), (latent_dim,), jnp.float32)
    p["wv"] = 0.02 * jax.random.normal(next(keys), (in_dim, latent_dim), jnp.float32)
    p["bv"] = 0.02 * jax.random.normal(next(keys), (latent_dim,), jnp.float32)
    return p


# ---------------------------------------------------------------------------
# Pure-JAX reference (independent path: lax.conv + explicit BN)
# ---------------------------------------------------------------------------
def encoder_ref(x, p, eps):
    prec = jax.lax.Precision.HIGHEST

    def conv_bn_relu(h, w, b, g, be, m, v):
        y = jax.lax.conv_general_dilated(
            h, w, window_strides=(2, 2), padding=((1, 1), (1, 1)),
            dimension_numbers=("NCHW", "OIHW", "NCHW"), precision=prec)
        y = y + b[None, :, None, None]
        y = (y - m[None, :, None, None]) / jnp.sqrt(v[None, :, None, None] + BN_EPS)
        y = y * g[None, :, None, None] + be[None, :, None, None]
        return jnp.maximum(y, 0.0)

    h = conv_bn_relu(x, p["w1"], p["b1"], p["g1"], p["be1"], p["m1"], p["v1"])
    h = conv_bn_relu(h, p["w2"], p["b2"], p["g2"], p["be2"], p["m2"], p["v2"])
    h = conv_bn_relu(h, p["w3"], p["b3"], p["g3"], p["be3"], p["m3"], p["v3"])
    flat = h.reshape(x.shape[0], -1)                       # NCHW flatten (torch order)
    mean = jnp.dot(flat, p["wm"], precision=prec) + p["bm"]
    log_var = jnp.dot(flat, p["wv"], precision=prec) + p["bv"]
    z = mean + jnp.exp(0.5 * log_var) * eps
    return mean, log_var, z


if __name__ == "__main__":
    B, Cin, input_size = 2, 3, 16
    latent = 8

    key = jax.random.PRNGKey(0)
    k_x, k_eps, k_p = jax.random.split(key, 3)
    x = jax.random.normal(k_x, (B, Cin, input_size, input_size), jnp.float32)
    eps = jax.random.normal(k_eps, (B, latent), jnp.float32)
    params = init_params(k_p, latent, input_size)

    enc = jax.jit(encoder_pallas)
    z_mean, z_log_var, z = enc(x, params, eps)
    jax.block_until_ready((z_mean, z_log_var, z))

    # Correctness check against an independent pure-JAX reference.
    zm_r, zv_r, z_r = encoder_ref(x, params, eps)
    assert z_mean.shape == (B, latent)
    assert z_log_var.shape == (B, latent)
    assert z.shape == (B, latent)
    # Tolerance covers bf16 MXU operands vs the HIGHEST-precision XLA reference;
    # logic bugs would show as O(1) errors.
    tol = dict(atol=3e-2, rtol=3e-2)
    assert jnp.allclose(z_mean, zm_r, **tol)
    assert jnp.allclose(z_log_var, zv_r, **tol)
    assert jnp.allclose(z, z_r, **tol)

    print("KERNEL_OK")
</pallas_src>

<mosaic_0001>
module attributes {stable_mosaic.version = 11 : i64} {
  func.func @_encoder_kernel(%arg0: i32, %arg1: memref<1x64x27xbf16, #tpu.memory_space<vmem>>, %arg2: memref<27x16xbf16, #tpu.memory_space<vmem>>, %arg3: memref<144x64xbf16, #tpu.memory_space<vmem>>, %arg4: memref<144x32xbf16, #tpu.memory_space<vmem>>, %arg5: memref<36x16xbf16, #tpu.memory_space<vmem>>, %arg6: memref<288x64xbf16, #tpu.memory_space<vmem>>, %arg7: memref<256x16xbf16, #tpu.memory_space<vmem>>, %arg8: memref<8x128xf32, #tpu.memory_space<vmem>>, %arg9: memref<1x1x8xf32, #tpu.memory_space<vmem>>, %arg10: memref<1x1x24xf32, #tpu.memory_space<vmem>>, %arg11: memref<16x144xf32, #tpu.memory_space<vmem>>, %arg12: memref<4x288xf32, #tpu.memory_space<vmem>>, %arg13: memref<1x256xf32, #tpu.memory_space<vmem>>) attributes {dimension_semantics = [#tpu.dimension_semantics<parallel>], iteration_bounds = array<i64: 2>, scalar_prefetch = 0 : i64, scratch_operands = 3 : i64, tpu.core_type = #tpu.core_type<tc>, window_params = [{transform_indices = @transform_0, window_bounds = array<i64: 1, 64, 27>}, {pipeline_mode = #tpu.pipeline_mode<synchronous>, transform_indices = @transform_1, window_bounds = array<i64: 27, 16>}, {pipeline_mode = #tpu.pipeline_mode<synchronous>, transform_indices = @transform_2, window_bounds = array<i64: 144, 64>}, {pipeline_mode = #tpu.pipeline_mode<synchronous>, transform_indices = @transform_3, window_bounds = array<i64: 144, 32>}, {pipeline_mode = #tpu.pipeline_mode<synchronous>, transform_indices = @transform_4, window_bounds = array<i64: 36, 16>}, {pipeline_mode = #tpu.pipeline_mode<synchronous>, transform_indices = @transform_5, window_bounds = array<i64: 288, 64>}, {pipeline_mode = #tpu.pipeline_mode<synchronous>, transform_indices = @transform_6, window_bounds = array<i64: 256, 16>}, {pipeline_mode = #tpu.pipeline_mode<synchronous>, transform_indices = @transform_7, window_bounds = array<i64: 8, 128>}, {transform_indices = @transform_8, window_bounds = array<i64: 1, 1, 8>}, {transform_indices = @transform_9, window_bounds = array<i64: 1, 1, 24>}]} {
    %c0 = arith.constant 0 : index
    %c0_0 = arith.constant 0 : index
    %0 = vector.load %arg8[%c0, %c0_0] : memref<8x128xf32, #tpu.memory_space<vmem>>, vector<1x16xf32>
    %c1 = arith.constant 1 : index
    %c0_1 = arith.constant 0 : index
    %1 = vector.load %arg8[%c1, %c0_1] : memref<8x128xf32, #tpu.memory_space<vmem>>, vector<1x16xf32>
    %c2 = arith.constant 2 : index
    %c0_2 = arith.constant 0 : index
    %2 = vector.load %arg8[%c2, %c0_2] : memref<8x128xf32, #tpu.memory_space<vmem>>, vector<1x32xf32>
    %c3 = arith.constant 3 : index
    %c0_3 = arith.constant 0 : index
    %3 = vector.load %arg8[%c3, %c0_3] : memref<8x128xf32, #tpu.memory_space<vmem>>, vector<1x32xf32>
    %c4 = arith.constant 4 : index
    %c0_4 = arith.constant 0 : index
    %4 = vector.load %arg8[%c4, %c0_4] : memref<8x128xf32, #tpu.memory_space<vmem>>, vector<1x64xf32>
    %c5 = arith.constant 5 : index
    %c0_5 = arith.constant 0 : index
    %5 = vector.load %arg8[%c5, %c0_5] : memref<8x128xf32, #tpu.memory_space<vmem>>, vector<1x64xf32>
    %c6 = arith.constant 6 : index
    %c0_6 = arith.constant 0 : index
    %6 = vector.load %arg8[%c6, %c0_6] : memref<8x128xf32, #tpu.memory_space<vmem>>, vector<1x16xf32>
    %c0_7 = arith.constant 0 : index
    %c0_8 = arith.constant 0 : index
    %c0_9 = arith.constant 0 : index
    %7 = vector.load %arg1[%c0_7, %c0_8, %c0_9] : memref<1x64x27xbf16, #tpu.memory_space<vmem>>, vector<1x64x27xbf16>
    %8 = vector.shape_cast %7 : vector<1x64x27xbf16> to vector<64x27xbf16>
    %c0_10 = arith.constant 0 : index
    %c0_11 = arith.constant 0 : index
    %9 = vector.load %arg2[%c0_10, %c0_11] : memref<27x16xbf16, #tpu.memory_space<vmem>>, vector<27x16xbf16>
    %cst = arith.constant dense<0.000000e+00> : vector<64x16xf32>
    %10 = tpu.matmul %8, %9, %cst {dimension_numbers = #tpu.dot_dimension_numbers<[1], [0], [0], [1], [0, 0, 1, 1], [], []>} : vector<64x27xbf16>, vector<27x16xbf16>, vector<64x16xf32> -> vector<64x16xf32>
    %11 = vector.broadcast %0 : vector<1x16xf32> to vector<64x16xf32>
    %12 = arith.mulf %10, %11 : vector<64x16xf32>
    %13 = vector.broadcast %1 : vector<1x16xf32> to vector<64x16xf32>
    %14 = arith.addf %12, %13 : vector<64x16xf32>
    %cst_12 = arith.constant 0.000000e+00 : f32
    %15 = vector.broadcast %cst_12 : f32 to vector<64x16xf32>
    %16 = arith.maximumf %14, %15 : vector<64x16xf32>
    %c0_13 = arith.constant 0 : index
    %c0_14 = arith.constant 0 : index
    %17 = vector.load %arg3[%c0_13, %c0_14] : memref<144x64xbf16, #tpu.memory_space<vmem>>, vector<144x64xbf16>
    %18 = arith.truncf %16 : vector<64x16xf32> to vector<64x16xbf16>
    %cst_15 = arith.constant dense<0.000000e+00> : vector<144x16xf32>
    %19 = tpu.matmul %17, %18, %cst_15 {dimension_numbers = #tpu.dot_dimension_numbers<[1], [0], [0], [1], [0, 0, 1, 1], [], []>} : vector<144x64xbf16>, vector<64x16xbf16>, vector<144x16xf32> -> vector<144x16xf32>
    %20 = vector.extract_strided_slice %19 {offsets = [0, 0], sizes = [16, 16], strides = [1, 1]} : vector<144x16xf32> to vector<16x16xf32>
    %c0_16 = arith.constant 0 : index
    %c0_17 = arith.constant 0 : index
    %21 = vector.load %arg11[%c0_16, %c0_17] : memref<16x144xf32, #tpu.memory_space<vmem>>, vector<16x16xf32>
    tpu.vector_store %arg11[%c0_16, %c0_17], %20 {strides = array<i32>} : memref<16x144xf32, #tpu.memory_space<vmem>>, vector<16x16xf32>,
    %22 = vector.extract_strided_slice %19 {offsets = [16, 0], sizes = [16, 16], strides = [1, 1]} : vector<144x16xf32> to vector<16x16xf32>
    %c0_18 = arith.constant 0 : index
    %c16 = arith.constant 16 : index
    %23 = vector.load %arg11[%c0_18, %c16] : memref<16x144xf32, #tpu.memory_space<vmem>>, vector<16x16xf32>
    tpu.vector_store %arg11[%c0_18, %c16], %22 {strides = array<i32>} : memref<16x144xf32, #tpu.memory_space<vmem>>, vector<16x16xf32>,
    %24 = vector.extract_strided_slice %19 {offsets = [32, 0], sizes = [16, 16], strides = [1, 1]} : vector<144x16xf32> to vector<16x16xf32>
    %c0_19 = arith.constant 0 : index
    %c32 = arith.constant 32 : index
    %25 = vector.load %arg11[%c0_19, %c32] : memref<16x144xf32, #tpu.memory_space<vmem>>, vector<16x16xf32>
    tpu.vector_store %arg11[%c0_19, %c32], %24 {strides = array<i32>} : memref<16x144xf32, #tpu.memory_space<vmem>>, vector<16x16xf32>,
    %26 = vector.extract_strided_slice %19 {offsets = [48, 0], sizes = [16, 16], strides = [1, 1]} : vector<144x16xf32> to vector<16x16xf32>
    %c0_20 = arith.constant 0 : index
    %c48 = arith.constant 48 : index
    %27 = vector.load %arg11[%c0_20, %c48] : memref<16x144xf32, #tpu.memory_space<vmem>>, vector<16x16xf32>
    tpu.vector_store %arg11[%c0_20, %c48], %26 {strides = array<i32>} : memref<16x144xf32, #tpu.memory_space<vmem>>, vector<16x16xf32>,
    %28 = vector.extract_strided_slice %19 {offsets = [64, 0], sizes = [16, 16], strides = [1, 1]} : vector<144x16xf32> to vector<16x16xf32>
    %c0_21 = arith.constant 0 : index
    %c64 = arith.constant 64 : index
    %29 = vector.load %arg11[%c0_21, %c64] : memref<16x144xf32, #tpu.memory_space<vmem>>, vector<16x16xf32>
    tpu.vector_store %arg11[%c0_21, %c64], %28 {strides = array<i32>} : memref<16x144xf32, #tpu.memory_space<vmem>>, vector<16x16xf32>,
    %30 = vector.extract_strided_slice %19 {offsets = [80, 0], sizes = [16, 16], strides = [1, 1]} : vector<144x16xf32> to vector<16x16xf32>
    %c0_22 = arith.constant 0 : index
    %c80 = arith.constant 80 : index
    %31 = vector.load %arg11[%c0_22, %c80] : memref<16x144xf32, #tpu.memory_space<vmem>>, vector<16x16xf32>
    tpu.vector_store %arg11[%c0_22, %c80], %30 {strides = array<i32>} : memref<16x144xf32, #tpu.memory_space<vmem>>, vector<16x16xf32>,
    %32 = vector.extract_strided_slice %19 {offsets = [96, 0], sizes = [16, 16], strides = [1, 1]} : vector<144x16xf32> to vector<16x16xf32>
    %c0_23 = arith.constant 0 : index
    %c96 = arith.constant 96 : index
    %33 = vector.load %arg11[%c0_23, %c96] : memref<16x144xf32, #tpu.memory_space<vmem>>, vector<16x16xf32>
    tpu.vector_store %arg11[%c0_23, %c96], %32 {strides = array<i32>} : memref<16x144xf32, #tpu.memory_space<vmem>>, vector<16x16xf32>,
    %34 = vector.extract_strided_slice %19 {offsets = [112, 0], sizes = [16, 16], strides = [1, 1]} : vector<144x16xf32> to vector<16x16xf32>
    %c0_24 = arith.constant 0 : index
    %c112 = arith.constant 112 : index
    %35 = vector.load %arg11[%c0_24, %c112] : memref<16x144xf32, #tpu.memory_space<vmem>>, vector<16x16xf32>
    tpu.vector_store %arg11[%c0_24, %c112], %34 {strides = array<i32>} : memref<16x144xf32, #tpu.memory_space<vmem>>, vector<16x16xf32>,
    %36 = vector.extract_strided_slice %19 {offsets = [128, 0], sizes = [16, 16], strides = [1, 1]} : vector<144x16xf32> to vector<16x16xf32>
    %c0_25 = arith.constant 0 : index
    %c128 = arith.constant 128 : index
    %37 = vector.load %arg11[%c0_25, %c128] : memref<16x144xf32, #tpu.memory_space<vmem>>, vector<16x16xf32>
    tpu.vector_store %arg11[%c0_25, %c128], %36 {strides = array<i32>} : memref<16x144xf32, #tpu.memory_space<vmem>>, vector<16x16xf32>,
    %c0_26 = arith.constant 0 : index
    %c0_27 = arith.constant 0 : index
    %38 = vector.load %arg11[%c0_26, %c0_27] : memref<16x144xf32, #tpu.memory_space<vmem>>, vector<16x144xf32>
    %39 = arith.truncf %38 : vector<16x144xf32> to vector<16x144xbf16>
    %c0_28 = arith.constant 0 : index
    %c0_29 = arith.constant 0 : index
    %40 = vector.load %arg4[%c0_28, %c0_29] : memref<144x32xbf16, #tpu.memory_space<vmem>>, vector<144x32xbf16>
    %cst_30 = arith.constant dense<0.000000e+00> : vector<16x32xf32>
    %41 = tpu.matmul %39, %40, %cst_30 {dimension_numbers = #tpu.dot_dimension_numbers<[1], [0], [0], [1], [0, 0, 1, 1], [], []>} : vector<16x144xbf16>, vector<144x32xbf16>, vector<16x32xf32> -> vector<16x32xf32>
    %42 = vector.broadcast %2 : vector<1x32xf32> to vector<16x32xf32>
    %43 = arith.mulf %41, %42 : vector<16x32xf32>
    %44 = vector.broadcast %3 : vector<1x32xf32> to vector<16x32xf32>
    %45 = arith.addf %43, %44 : vector<16x32xf32>
    %cst_31 = arith.constant 0.000000e+00 : f32
    %46 = vector.broadcast %cst_31 : f32 to vector<16x32xf32>
    %47 = arith.maximumf %45, %46 : vector<16x32xf32>
    %c0_32 = arith.constant 0 : index
    %c0_33 = arith.constant 0 : index
    %48 = vector.load %arg5[%c0_32, %c0_33] : memref<36x16xbf16, #tpu.memory_space<vmem>>, vector<36x16xbf16>
    %49 = arith.truncf %47 : vector<16x32xf32> to vector<16x32xbf16>
    %cst_34 = arith.constant dense<0.000000e+00> : vector<36x32xf32>
    %50 = tpu.matmul %48, %49, %cst_34 {dimension_numbers = #tpu.dot_dimension_numbers<[1], [0], [0], [1], [0, 0, 1, 1], [], []>} : vector<36x16xbf16>, vector<16x32xbf16>, vector<36x32xf32> -> vector<36x32xf32>
    %51 = vector.extract_strided_slice %50 {offsets = [0, 0], sizes = [4, 32], strides = [1, 1]} : vector<36x32xf32> to vector<4x32xf32>
    %c0_35 = arith.constant 0 : index
    %c0_36 = arith.constant 0 : index
    %52 = vector.load %arg12[%c0_35, %c0_36] : memref<4x288xf32, #tpu.memory_space<vmem>>, vector<4x32xf32>
    tpu.vector_store %arg12[%c0_35, %c0_36], %51 {strides = array<i32>} : memref<4x288xf32, #tpu.memory_space<vmem>>, vector<4x32xf32>,
    %53 = vector.extract_strided_slice %50 {offsets = [4, 0], sizes = [4, 32], strides = [1, 1]} : vector<36x32xf32> to vector<4x32xf32>
    %c0_37 = arith.constant 0 : index
    %c32_38 = arith.constant 32 : index
    %54 = vector.load %arg12[%c0_37, %c32_38] : memref<4x288xf32, #tpu.memory_space<vmem>>, vector<4x32xf32>
    tpu.vector_store %arg12[%c0_37, %c32_38], %53 {strides = array<i32>} : memref<4x288xf32, #tpu.memory_space<vmem>>, vector<4x32xf32>,
    %55 = vector.extract_strided_slice %50 {offsets = [8, 0], sizes = [4, 32], strides = [1, 1]} : vector<36x32xf32> to vector<4x32xf32>
    %c0_39 = arith.constant 0 : index
    %c64_40 = arith.constant 64 : index
    %56 = vector.load %arg12[%c0_39, %c64_40] : memref<4x288xf32, #tpu.memory_space<vmem>>, vector<4x32xf32>
    tpu.vector_store %arg12[%c0_39, %c64_40], %55 {strides = array<i32>} : memref<4x288xf32, #tpu.memory_space<vmem>>, vector<4x32xf32>,
    %57 = vector.extract_strided_slice %50 {offsets = [12, 0], sizes = [4, 32], strides = [1, 1]} : vector<36x32xf32> to vector<4x32xf32>
    %c0_41 = arith.constant 0 : index
    %c96_42 = arith.constant 96 : index
    %58 = vector.load %arg12[%c0_41, %c96_42] : memref<4x288xf32, #tpu.memory_space<vmem>>, vector<4x32xf32>
    tpu.vector_store %arg12[%c0_41, %c96_42], %57 {strides = array<i32>} : memref<4x288xf32, #tpu.memory_space<vmem>>, vector<4x32xf32>,
    %59 = vector.extract_strided_slice %50 {offsets = [16, 0], sizes = [4, 32], strides = [1, 1]} : vector<36x32xf32> to vector<4x32xf32>
    %c0_43 = arith.constant 0 : index
    %c128_44 = arith.constant 128 : index
    %60 = vector.load %arg12[%c0_43, %c128_44] : memref<4x288xf32, #tpu.memory_space<vmem>>, vector<4x32xf32>
    tpu.vector_store %arg12[%c0_43, %c128_44], %59 {strides = array<i32>} : memref<4x288xf32, #tpu.memory_space<vmem>>, vector<4x32xf32>,
    %61 = vector.extract_strided_slice %50 {offsets = [20, 0], sizes = [4, 32], strides = [1, 1]} : vector<36x32xf32> to vector<4x32xf32>
    %c0_45 = arith.constant 0 : index
    %c160 = arith.constant 160 : index
    %62 = vector.load %arg12[%c0_45, %c160] : memref<4x288xf32, #tpu.memory_space<vmem>>, vector<4x32xf32>
    tpu.vector_store %arg12[%c0_45, %c160], %61 {strides = array<i32>} : memref<4x288xf32, #tpu.memory_space<vmem>>, vector<4x32xf32>,
    %63 = vector.extract_strided_slice %50 {offsets = [24, 0], sizes = [4, 32], strides = [1, 1]} : vector<36x32xf32> to vector<4x32xf32>
    %c0_46 = arith.constant 0 : index
    %c192 = arith.constant 192 : index
    %64 = vector.load %arg12[%c0_46, %c192] : memref<4x288xf32, #tpu.memory_space<vmem>>, vector<4x32xf32>
    tpu.vector_store %arg12[%c0_46, %c192], %63 {strides = array<i32>} : memref<4x288xf32, #tpu.memory_space<vmem>>, vector<4x32xf32>,
    %65 = vector.extract_strided_slice %50 {offsets = [28, 0], sizes = [4, 32], strides = [1, 1]} : vector<36x32xf32> to vector<4x32xf32>
    %c0_47 = arith.constant 0 : index
    %c224 = arith.constant 224 : index
    %66 = vector.load %arg12[%c0_47, %c224] : memref<4x288xf32, #tpu.memory_space<vmem>>, vector<4x32xf32>
    tpu.vector_store %arg12[%c0_47, %c224], %65 {strides = array<i32>} : memref<4x288xf32, #tpu.memory_space<vmem>>, vector<4x32xf32>,
    %67 = vector.extract_strided_slice %50 {offsets = [32, 0], sizes = [4, 32], strides = [1, 1]} : vector<36x32xf32> to vector<4x32xf32>
    %c0_48 = arith.constant 0 : index
    %c256 = arith.constant 256 : index
    %68 = vector.load %arg12[%c0_48, %c256] : memref<4x288xf32, #tpu.memory_space<vmem>>, vector<4x32xf32>
    tpu.vector_store %arg12[%c0_48, %c256], %67 {strides = array<i32>} : memref<4x288xf32, #tpu.memory_space<vmem>>, vector<4x32xf32>,
    %c0_49 = arith.constant 0 : index
    %c0_50 = arith.constant 0 : index
    %69 = vector.load %arg12[%c0_49, %c0_50] : memref<4x288xf32, #tpu.memory_space<vmem>>, vector<4x288xf32>
    %70 = arith.truncf %69 : vector<4x288xf32> to vector<4x288xbf16>
    %c0_51 = arith.constant 0 : index
    %c0_52 = arith.constant 0 : index
    %71 = vector.load %arg6[%c0_51, %c0_52] : memref<288x64xbf16, #tpu.memory_space<vmem>>, vector<288x64xbf16>
    %cst_53 = arith.constant dense<0.000000e+00> : vector<4x64xf32>
    %72 = tpu.matmul %70, %71, %cst_53 {dimension_numbers = #tpu.dot_dimension_numbers<[1], [0], [0], [1], [0, 0, 1, 1], [], []>} : vector<4x288xbf16>, vector<288x64xbf16>, vector<4x64xf32> -> vector<4x64xf32>
    %73 = vector.broadcast %4 : vector<1x64xf32> to vector<4x64xf32>
    %74 = arith.mulf %72, %73 : vector<4x64xf32>
    %75 = vector.broadcast %5 : vector<1x64xf32> to vector<4x64xf32>
    %76 = arith.addf %74, %75 : vector<4x64xf32>
    %cst_54 = arith.constant 0.000000e+00 : f32
    %77 = vector.broadcast %cst_54 : f32 to vector<4x64xf32>
    %78 = arith.maximumf %76, %77 : vector<4x64xf32>
    %79 = vector.extract_strided_slice %78 {offsets = [0, 0], sizes = [1, 64], strides = [1, 1]} : vector<4x64xf32> to vector<1x64xf32>
    %c0_55 = arith.constant 0 : index
    %c0_56 = arith.constant 0 : index
    %80 = vector.load %arg13[%c0_55, %c0_56] : memref<1x256xf32, #tpu.memory_space<vmem>>, vector<1x64xf32>
    tpu.vector_store %arg13[%c0_55, %c0_56], %79 {strides = array<i32>} : memref<1x256xf32, #tpu.memory_space<vmem>>, vector<1x64xf32>,
    %81 = vector.extract_strided_slice %78 {offsets = [1, 0], sizes = [1, 64], strides = [1, 1]} : vector<4x64xf32> to vector<1x64xf32>
    %c0_57 = arith.constant 0 : index
    %c64_58 = arith.constant 64 : index
    %82 = vector.load %arg13[%c0_57, %c64_58] : memref<1x256xf32, #tpu.memory_space<vmem>>, vector<1x64xf32>
    tpu.vector_store %arg13[%c0_57, %c64_58], %81 {strides = array<i32>} : memref<1x256xf32, #tpu.memory_space<vmem>>, vector<1x64xf32>,
    %83 = vector.extract_strided_slice %78 {offsets = [2, 0], sizes = [1, 64], strides = [1, 1]} : vector<4x64xf32> to vector<1x64xf32>
    %c0_59 = arith.constant 0 : index
    %c128_60 = arith.constant 128 : index
    %84 = vector.load %arg13[%c0_59, %c128_60] : memref<1x256xf32, #tpu.memory_space<vmem>>, vector<1x64xf32>
    tpu.vector_store %arg13[%c0_59, %c128_60], %83 {strides = array<i32>} : memref<1x256xf32, #tpu.memory_space<vmem>>, vector<1x64xf32>,
    %85 = vector.extract_strided_slice %78 {offsets = [3, 0], sizes = [1, 64], strides = [1, 1]} : vector<4x64xf32> to vector<1x64xf32>
    %c0_61 = arith.constant 0 : index
    %c192_62 = arith.constant 192 : index
    %86 = vector.load %arg13[%c0_61, %c192_62] : memref<1x256xf32, #tpu.memory_space<vmem>>, vector<1x64xf32>
    tpu.vector_store %arg13[%c0_61, %c192_62], %85 {strides = array<i32>} : memref<1x256xf32, #tpu.memory_space<vmem>>, vector<1x64xf32>,
    %c0_63 = arith.constant 0 : index
    %c0_64 = arith.constant 0 : index
    %87 = vector.load %arg13[%c0_63, %c0_64] : memref<1x256xf32, #tpu.memory_space<vmem>>, vector<1x256xf32>
    %88 = arith.truncf %87 : vector<1x256xf32> to vector<1x256xbf16>
    %c0_65 = arith.constant 0 : index
    %c0_66 = arith.constant 0 : index
    %89 = vector.load %arg7[%c0_65, %c0_66] : memref<256x16xbf16, #tpu.memory_space<vmem>>, vector<256x16xbf16>
    %cst_67 = arith.constant dense<0.000000e+00> : vector<1x16xf32>
    %90 = tpu.matmul %88, %89, %cst_67 {dimension_numbers = #tpu.dot_dimension_numbers<[1], [0], [0], [1], [0, 0, 1, 1], [], []>} : vector<1x256xbf16>, vector<256x16xbf16>, vector<1x16xf32> -> vector<1x16xf32>
    %91 = arith.addf %90, %6 : vector<1x16xf32>
    %92 = vector.extract_strided_slice %91 {offsets = [0, 0], sizes = [1, 8], strides = [1, 1]} : vector<1x16xf32> to vector<1x8xf32>
    %93 = vector.extract_strided_slice %91 {offsets = [0, 8], sizes = [1, 8], strides = [1, 1]} : vector<1x16xf32> to vector<1x8xf32>
    %cst_68 = arith.constant 5.000000e-01 : f32
    %94 = vector.broadcast %cst_68 : f32 to vector<1x8xf32>
    %95 = arith.mulf %94, %93 : vector<1x8xf32>
    %96 = math.exp %95 : vector<1x8xf32>
    %c0_69 = arith.constant 0 : index
    %c0_70 = arith.constant 0 : index
    %c0_71 = arith.constant 0 : index
    %97 = vector.load %arg9[%c0_69, %c0_70, %c0_71] : memref<1x1x8xf32, #tpu.memory_space<vmem>>, vector<1x1x8xf32>
    %98 = vector.shape_cast %97 : vector<1x1x8xf32> to vector<1x8xf32>
    %99 = arith.mulf %96, %98 : vector<1x8xf32>
    %100 = arith.addf %92, %99 : vector<1x8xf32>
    %c0_72 = arith.constant 0 : index
    %c0_73 = arith.constant 0 : index
    %c0_74 = arith.constant 0 : index
    %101 = vector.load %arg10[%c0_72, %c0_73, %c0_74] : memref<1x1x24xf32, #tpu.memory_space<vmem>>, vector<1x1x16xf32>
    %102 = vector.shape_cast %101 : vector<1x1x16xf32> to vector<1x16xf32>
    %103 = vector.shape_cast %91 : vector<1x16xf32> to vector<1x1x16xf32>
    tpu.vector_store %arg10[%c0_72, %c0_73, %c0_74], %103 {strides = array<i32>} : memref<1x1x24xf32, #tpu.memory_space<vmem>>, vector<1x1x16xf32>,
    %c0_75 = arith.constant 0 : index
    %c0_76 = arith.constant 0 : index
    %c16_77 = arith.constant 16 : index
    %104 = vector.load %arg10[%c0_75, %c0_76, %c16_77] : memref<1x1x24xf32, #tpu.memory_space<vmem>>, vector<1x1x8xf32>
    %105 = vector.shape_cast %104 : vector<1x1x8xf32> to vector<1x8xf32>
    %106 = vector.shape_cast %100 : vector<1x8xf32> to vector<1x1x8xf32>
    tpu.vector_store %arg10[%c0_75, %c0_76, %c16_77], %106 {strides = array<i32>} : memref<1x1x24xf32, #tpu.memory_space<vmem>>, vector<1x1x8xf32>,
    return
  }
  func.func @transform_0(%arg0: i32) -> (i32, i32, i32) {
    %c0_i32 = arith.constant 0 : i32
    %c0_i32_0 = arith.constant 0 : i32
    %c0_i32_1 = arith.constant 0 : i32
    return %arg0, %c0_i32, %c0_i32_0 : i32, i32, i32
  }
  func.func @transform_1(%arg0: i32) -> (i32, i32) {
    %c0_i32 = arith.constant 0 : i32
    %c0_i32_0 = arith.constant 0 : i32
    %c0_i32_1 = arith.constant 0 : i32
    return %c0_i32, %c0_i32_0 : i32, i32
  }
  func.func @transform_2(%arg0: i32) -> (i32, i32) {
    %c0_i32 = arith.constant 0 : i32
    %c0_i32_0 = arith.constant 0 : i32
    %c0_i32_1 = arith.constant 0 : i32
    return %c0_i32, %c0_i32_0 : i32, i32
  }
  func.func @transform_3(%arg0: i32) -> (i32, i32) {
    %c0_i32 = arith.constant 0 : i32
    %c0_i32_0 = arith.constant 0 : i32
    %c0_i32_1 = arith.constant 0 : i32
    return %c0_i32, %c0_i32_0 : i32, i32
  }
  func.func @transform_4(%arg0: i32) -> (i32, i32) {
    %c0_i32 = arith.constant 0 : i32
    %c0_i32_0 = arith.constant 0 : i32
    %c0_i32_1 = arith.constant 0 : i32
    return %c0_i32, %c0_i32_0 : i32, i32
  }
  func.func @transform_5(%arg0: i32) -> (i32, i32) {
    %c0_i32 = arith.constant 0 : i32
    %c0_i32_0 = arith.constant 0 : i32
    %c0_i32_1 = arith.constant 0 : i32
    return %c0_i32, %c0_i32_0 : i32, i32
  }
  func.func @transform_6(%arg0: i32) -> (i32, i32) {
    %c0_i32 = arith.constant 0 : i32
    %c0_i32_0 = arith.constant 0 : i32
    %c0_i32_1 = arith.constant 0 : i32
    return %c0_i32, %c0_i32_0 : i32, i32
  }
  func.func @transform_7(%arg0: i32) -> (i32, i32) {
    %c0_i32 = arith.constant 0 : i32
    %c0_i32_0 = arith.constant 0 : i32
    %c0_i32_1 = arith.constant 0 : i32
    return %c0_i32, %c0_i32_0 : i32, i32
  }
  func.func @transform_8(%arg0: i32) -> (i32, i32, i32) {
    %c0_i32 = arith.constant 0 : i32
    %c0_i32_0 = arith.constant 0 : i32
    %c0_i32_1 = arith.constant 0 : i32
    return %arg0, %c0_i32, %c0_i32_0 : i32, i32, i32
  }
  func.func @transform_9(%arg0: i32) -> (i32, i32, i32) {
    %c0_i32 = arith.constant 0 : i32
    %c0_i32_0 = arith.constant 0 : i32
    %c0_i32_1 = arith.constant 0 : i32
    return %arg0, %c0_i32, %c0_i32_0 : i32, i32, i32
  }
}

</mosaic_0001>

<bundles_post_ra>
// kernel: encoder_pallas.1
= control target key start
LH: loop header
LB: loop body
LE: loop exit
PB: predicated region body
PF: predicated region fallthrough
CT: control target
= control target key end

     0   :  { %s1819_s30 = smov 0   ;;  %s2111_s0 = inlined_call_operand.vmem [shape: bf16[2,64,27], index: 0, kind: input, shape index: {}]   ;;  %s2112_s1 = inlined_call_operand.vmem [shape: bf16[27,16], index: 1, kind: input, shape index: {}]   ;;  %s2113_s2 = inlined_call_operand.vmem [shape: bf16[144,64], index: 2, kind: input, shape index: {}]   ;;  %s2114_s3 = inlined_call_operand.vmem [shape: bf16[144,32], index: 3, kind: input, shape index: {}]   ;;  %s2115_s4 = inlined_call_operand.vmem [shape: bf16[36,16], index: 4, kind: input, shape index: {}]   ;;  %s2116_s5 = inlined_call_operand.vmem [shape: bf16[288,64], index: 5, kind: input, shape index: {}]   ;;  %s2117_s6 = inlined_call_operand.vmem [shape: bf16[256,16], index: 6, kind: input, shape index: {}]   ;;  %s2118_s7 = inlined_call_operand.vmem [shape: f32[8,128], index: 7, kind: input, shape index: {}]   ;;  %s2119_s8 = inlined_call_operand.vmem [shape: f32[2,1,8], index: 8, kind: input, shape index: {}]   ;;  %s2120_s9 = inlined_call_operand.vmem [shape: f32[2,1,24], index: 9, kind: output, shape index: {}]  }
   0x1 LB: > { %s1392_s10 = sadd.s32 4294967295, %s1757_s30   ;;  %p1396_p0 = scmp.ge.s32.totalorder %s1757_s30, 1  ;;  %s1757_s30 = sphi %s1819_s30, %s19_s30  }
   0x2   : > { %p295_p1 = scmp.lt.s32.totalorder %s1757_s30, 3 }
   0x4   : > { %p296_p2 = pnand %p1396_p0, %p295_p1 }
   0x5   : > { %p332_p3 = scmp.lt.s32.totalorder (!%p296_p2), %s1392_s10, 1  ;;  %s1760_s22 = smov (!%p296_p2), 32  }
   0x6   : > { %299 = sbr.rel (%p296_p2) target bundleno = 1671 (0x687), region = 56  ;;  %s1761_s23 = smov (!%p296_p2), 48  }
   0x7   : > { %s1762_s24 = smov (!%p296_p2), 16   ;;  %s1763_s27 = smov (!%p296_p2), 64  }
   0x8   : > { %s1764_s28 = smov (!%p296_p2), 80   ;;  %s1765_s29 = smov (!%p296_p2), 96  }
   0x9   : > { %s1766_s11 = smov (!%p296_p2), 112   ;;  %s1767_s17 = smov (!%p296_p2), 8  }
   0xb   : > { %v1421_v0 = vld [vmem:[%s2112_s1 + $0x8] sm:$0xf]  ;;  %v1665_v1 = vld [vmem:[%s2112_s1 + $0x8] sm:$0x30]  ;;  %vm407_vm0 = vcmask 1044480   ;;  %vm408_vm1 = vcmask 1045504  }
   0xc   : > { %v1422_v2 = vor.u32 %v1665_v1, %v1421_v0  ;;  %v1759_v3 = vmov 65535   ;;  %s2126_s10 = smov (!%p332_p3, %s1392_s10), 1  ;;  %v1664_v7 = vld [vmem:[%s2112_s1] sm:$0xff]  ;;  %vm394_vm2 = vcmask 220160   ;;  %v1668_v51 = vld [vmem:[%s2113_s2 + $0x10] sm:$0xff]  ;;  %vm536_vm3 = vcmask 523264  }
   0xd   : > { %v409_v4 = vsel %vm407_vm0, 4294967295, %v1759_v3  ;;  %s1659_s15 = sshll.u32 %s2126_s10, 5  ;;  %v1742_v19 = vld [vmem:[%s2118_s7] ss:$0 sm:$0xff]  ;;  %v1743_v21 = vld [vmem:[%s2118_s7 + $0x1] ss:$0 sm:$0xff]  ;;  %s342_s21 = scalar_lea.vmem %s2120_s9, %s2126_s10 }
   0xe   : > { %v410_v5 = vsel %vm408_vm1, %v409_v4, 0  ;;  %s336_s20 = scalar_lea.vmem %s2111_s0, %s1659_s15  ;;  %v1666_v50 = vld [vmem:[%s2113_s2] sm:$0xff]  ;;  %v1667_v52 = vld [vmem:[%s2113_s2 + $0x8] sm:$0xff]  ;;  %v1669_v53 = vld [vmem:[%s2113_s2 + $0x18] sm:$0xff]  ;;  %vm618_vm4 = vcmask 130048   ;;  %vm629_vm5 = vcmask 261248  }
   0xf   : > { %v412_v6 = vand.u32 %v1422_v2, %v410_v5  ;;  %v1660_v8 = vld [vmem:[%s336_s20] sm:$0xff]  ;;  %v1661_v9 = vld [vmem:[%s336_s20 + $0x8] sm:$0xff]  ;;  %v1662_v10 = vld [vmem:[%s336_s20 + $0x10] sm:$0xff]  ;;  %vm640_vm6 = vcmask 392448   ;;  %vm651_vm7 = vcmask 523648   ;;  %vm662_vm8 = vcmask 654848  }
  0x10   : > { %v1663_v11 = vld [vmem:[%s336_s20 + $0x18] sm:$0xff]  ;;  %v1670_v54 = vld [vmem:[%s2113_s2 + $0x20] sm:$0xff]  ;;  %v1671_v55 = vld [vmem:[%s2113_s2 + $0x28] sm:$0xff]  ;;  %vm673_vm9 = vcmask 786048   ;;  %vm684_vm10 = vcmask 917248   ;;  %vm695_vm11 = vcmask 1048448  }
  0x11   : > { %420 = vmatpush.bf16.msra.mxu0 %v412_v6  ;;  %v1672_v56 = vld [vmem:[%s2113_s2 + $0x30] sm:$0xff]  ;;  %v1673_v57 = vld [vmem:[%s2113_s2 + $0x38] sm:$0xff]  ;;  %v1674_v0 = vld [vmem:[%s2113_s2 + $0x40] sm:$0xff]  ;;  %vm868_vm12 = vcmask 257024   ;;  %vm877_vm13 = vcmask 519424   ;;  %vm883_vm14 = vcmask 781824  }
  0x12   : > { %vm1075_vm15 = vcmask 261120   ;;  %vm891_vm0 = vcmask 1044224  }
  0x15   : > { %421 = vmatpush.bf16.msra.mxu0 %v1664_v7 }
  0x18   : > { %1423 = vmatmul.msk.bf16.vlgmr.msra.gmra.mxu0 %vm394_vm2, %v1660_v8 }
  0x28   : > { %1424 = vmatmul.msk.bf16.gmra.mxu0 %vm394_vm2, %v1661_v9 }
  0x38   : > { %1425 = vmatmul.msk.bf16.gmra.mxu0 %vm394_vm2, %v1662_v10 }
  0x48   : > { %1426 = vmatmul.msk.bf16.gmra.mxu0 %vm394_vm2, %v1663_v11 }
  0x95   : > { %v423_v12 = vpop.f32.mrf.mxu0 }
  0x96   : > { %v444_v38 = vmul.f32 %v1742_v19, %v423_v12 }
  0x98   : > { %v453_v44 = vadd.f32 %v1743_v21, %v444_v38 }
  0x9a   : > { %v461_v48 = vmax.f32 %v453_v44, 0.0 }
  0x9d   : > { %v425_v13 = vpop.f32.mrf.mxu0 }
  0x9e   : > { %v445_v34 = vmul.f32 %v1742_v19, %v425_v13 }
  0xa0   : > { %v454_v41 = vadd.f32 %v1743_v21, %v445_v34  ;;  %v1676_v34 = vld [vmem:[%s2114_s3 + $0x8] sm:$0xff] }
  0xa2   : > { %v462_v46 = vmax.f32 %v454_v41, 0.0 }
  0xa4   : > { %v487_v49 = vpack.c.bf16 %v462_v46, %v461_v48 }
  0xa5   : > { %v428_v14 = vpop.f32.mrf.mxu0 }
  0xa6   : > { %v446_v30 = vmul.f32 %v1742_v19, %v428_v14 }
  0xa8   : > { %v455_v39 = vadd.f32 %v1743_v21, %v446_v30 }
  0xaa   : > { %v463_v45 = vmax.f32 %v455_v39, 0.0 }
  0xad   : > { %v430_v15 = vpop.f32.mrf.mxu0 }
  0xae   : > { %v447_v27 = vmul.f32 %v1742_v19, %v430_v15 }
  0xb0   : > { %v456_v35 = vadd.f32 %v1743_v21, %v447_v27 }
  0xb2   : > { %v464_v42 = vmax.f32 %v456_v35, 0.0  ;;  %v1675_v35 = vld [vmem:[%s2114_s3] sm:$0xff] }
  0xb4   : > { %v488_v47 = vpack.c.bf16 %v464_v42, %v463_v45  ;;  %v1744_v45 = vld [vmem:[%s2118_s7 + $0x2] ss:$0 sm:$0xff] }
  0xb5   : > { %v433_v16 = vpop.f32.mrf.mxu0 }
  0xb6   : > { %v448_v24 = vmul.f32 %v1742_v19, %v433_v16 }
  0xb8   : > { %v457_v31 = vadd.f32 %v1743_v21, %v448_v24 }
  0xba   : > { %v465_v40 = vmax.f32 %v457_v31, 0.0  ;;  %v1677_v31 = vld [vmem:[%s2114_s3 + $0x10] sm:$0xff] }
  0xbd   : > { %v435_v17 = vpop.f32.mrf.mxu0 }
  0xbe   : > { %v449_v22 = vmul.f32 %v1742_v19, %v435_v17 }
  0xc0   : > { %v458_v28 = vadd.f32 %v1743_v21, %v449_v22  ;;  %v1681_v22 = vld [vmem:[%s2114_s3 + $0x30] sm:$0xff] }
  0xc2   : > { %v466_v36 = vmax.f32 %v458_v28, 0.0 }
  0xc4   : > { %v489_v43 = vpack.c.bf16 %v466_v36, %v465_v40 }
  0xc5   : > { %v438_v18 = vpop.f32.mrf.mxu0 }
  0xc6   : > { %v450_v20 = vmul.f32 %v1742_v19, %v438_v18 }
  0xc8   : > { %v459_v25 = vadd.f32 %v1743_v21, %v450_v20  ;;  %v1682_v20 = vld [vmem:[%s2114_s3 + $0x38] sm:$0xff] }
  0xc9   : > { %781 = vmatpush.bf16.msra.mxu2 %v1682_v20  ;;  %v1696_v20 = vld [vmem:[%s2116_s5 + $0x50] sm:$0xff] }
  0xca   : > { %v467_v32 = vmax.f32 %v459_v25, 0.0 }
  0xcd   : > { %v440_v23 = vpop.f32.mrf.mxu0  ;;  %782 = vmatpush.bf16.msra.mxu2 %v1681_v22 }
  0xce   : > { %v451_v26 = vmul.f32 %v1742_v19, %v440_v23  ;;  %v1680_v23 = vld [vmem:[%s2114_s3 + $0x28] sm:$0xff] }
  0xd0   : > { %v460_v29 = vadd.f32 %v1743_v21, %v451_v26  ;;  %v1683_v21 = vld [vmem:[%s2114_s3 + $0x40] sm:$0xff] }
  0xd1   : > { %802 = vmatpush.bf16.msra.mxu3 %v1683_v21  ;;  %783 = vmatpush.bf16.msra.mxu2 %v1680_v23  ;;  %v1679_v26 = vld [vmem:[%s2114_s3 + $0x20] sm:$0xff]  ;;  %v1703_v23 = vld [vmem:[%s2116_s5 + $0x88] sm:$0xff] }
  0xd2   : > { %v468_v33 = vmax.f32 %v460_v29, 0.0  ;;  %v1678_v29 = vld [vmem:[%s2114_s3 + $0x18] sm:$0xff] }
  0xd4   : > { %v490_v37 = vpack.c.bf16 %v468_v33, %v467_v32 }
  0xd5   : > { %784 = vmatpush.bf16.msra.mxu2 %v1679_v26  ;;  %v1686_v26 = vld [vmem:[%s2116_s5] sm:$0xff] }
  0xd6   : > { %568 = vmatpush.bf16.msrb.mxu0 %v490_v37  ;;  %1720 = vmatpush.bf16.msra.mxu1 %v490_v37 }
  0xd9   : > { %785 = vmatpush.bf16.msra.mxu2 %v1678_v29 }
  0xda   : > { %569 = vmatpush.bf16.msrb.mxu0 %v489_v43  ;;  %1721 = vmatpush.bf16.msra.mxu1 %v489_v43 }
  0xdd   : > { %786 = vmatpush.bf16.msra.mxu2 %v1677_v31 }
  0xde   : > { %570 = vmatpush.bf16.msrb.mxu0 %v488_v47  ;;  %1722 = vmatpush.bf16.msra.mxu1 %v488_v47  ;;  %v1745_v47 = vld [vmem:[%s2118_s7 + $0x3] ss:$0 sm:$0xff] }
  0xe1   : > { %787 = vmatpush.bf16.msra.mxu2 %v1676_v34 }
  0xe2   : > { %571 = vmatpush.bf16.msrb.mxu0 %v487_v49  ;;  %1723 = vmatpush.bf16.msra.mxu1 %v487_v49 }
  0xe5   : > { %1463 = vmatmul.msk.bf16.vlgmr.msrb.gmra.mxu0 %vm536_vm3, %v1666_v50  ;;  %1465 = vmatmul.msk.bf16.vlgmr.msra.gmra.mxu1 %vm536_vm3, %v1668_v51 }
  0xe6   : > { %788 = vmatpush.bf16.msra.mxu2 %v1675_v35  ;;  %1111 = vmatpush.bf16.msra.mxu0 %v1703_v23 }
  0xf5   : > { %1464 = vmatmul.msk.bf16.gmra.mxu0 %vm536_vm3, %v1667_v52  ;;  %1466 = vmatmul.msk.bf16.gmra.mxu1 %vm536_vm3, %v1669_v53 }
 0x105   : > { %1467 = vmatmul.msk.bf16.gmra.mxu1 %vm536_vm3, %v1670_v54 }
 0x115   : > { %1468 = vmatmul.msk.bf16.gmra.mxu1 %vm536_vm3, %v1671_v55 }
 0x125   : > { %1469 = vmatmul.msk.bf16.gmra.mxu1 %vm536_vm3, %v1672_v56 }
 0x135   : > { %1470 = vmatmul.msk.bf16.gmra.mxu1 %vm536_vm3, %v1673_v57  ;;  %v1684_v57 = vld [vmem:[%s2115_s4] sm:$0xff] }
 0x145   : > { %1471 = vmatmul.msk.bf16.gmra.mxu1 %vm536_vm3, %v1674_v0 }
 0x162   : > { %v573_v58 = vpop.f32.mrf.mxu0  ;;  %v583_v59 = vpop.f32.mrf.mxu1 }
 0x163   : > { %619 = vst.msk [vmem:[#allocation2] sm:$0xff] %vm618_vm4, %v573_v58  ;;  %634 = vrot.lane.b32.xlu1 %v583_v59, %s1760_s22  ;;  %v1685_v58 = vld [vmem:[%s2115_s4 + $0x8] sm:$0xff]  ;;  %v821_v59 = vld [vmem:[%s2115_s4 + $0x10] sm:$0x3] }
 0x16a   : > { %v575_v60 = vpop.f32.mrf.mxu0  ;;  %v585_v61 = vpop.f32.mrf.mxu1 }
 0x16b   : > { %620 = vst.msk [vmem:[#allocation2 + $0x10] sm:$0xff] %vm618_vm4, %v575_v60  ;;  %636 = vrot.lane.b32.xlu1 %v585_v61, %s1760_s22  ;;  %v832_v60 = vunpack.c.l.b16 %v821_v59  ;;  %v1710_v59 = vld [vmem:[%s2117_s6 + $0x30] sm:$0xff] }
 0x16d   : > { %v835_v61 = vpack.c.b16 %v832_v60, %v832_v60  ;;  %v1718_v60 = vld [vmem:[%s2117_s6 + $0x70] sm:$0xff] }
 0x172   : > { %v578_v62 = vpop.f32.mrf.mxu0  ;;  %v588_v63 = vpop.f32.mrf.mxu1 }
 0x173   : > { %645 = vrot.lane.b32.xlu2 %v588_v63, %s1761_s23  ;;  %623 = vrot.lane.b32.xlu0 %v578_v62, %s1762_s24 }
 0x17a   : > { %v580_v1 = vpop.f32.mrf.mxu0  ;;  %v590_v2 = vpop.f32.mrf.mxu1 }
 0x17b   : > { %647 = vrot.lane.b32.xlu2 %v590_v2, %s1761_s23  ;;  %625 = vrot.lane.b32.xlu0 %v580_v1, %s1762_s24  ;;  %s1768_s23 = smov 120  }
 0x182   : > { %v593_v3 = vpop.f32.mrf.mxu1 }
 0x183   : > { %656 = vrot.lane.b32.xlu0 %v593_v3, %s1763_s27 }
 0x18a   : > { %v595_v4 = vpop.f32.mrf.mxu1 }
 0x18b   : > { %658 = vrot.lane.b32.xlu1 %v595_v4, %s1763_s27 }
 0x192   : > { %v598_v5 = vpop.f32.mrf.mxu1 }
 0x193   : > { %667 = vrot.lane.b32.xlu2 %v598_v5, %s1764_s28 }
 0x19a   : > { %v600_v6 = vpop.f32.mrf.mxu1 }
 0x19b   : > { %669 = vrot.lane.b32.xlu0 %v600_v6, %s1764_s28  ;;  %v1701_v6 = vld [vmem:[%s2116_s5 + $0x78] sm:$0xff] }
 0x1a2   : > { %v603_v7 = vpop.f32.mrf.mxu1 }
 0x1a3   : > { %678 = vrot.lane.b32.xlu1 %v603_v7, %s1765_s29  ;;  %v1693_v7 = vld [vmem:[%s2116_s5 + $0x38] sm:$0xff] }
 0x1a4   : > { %1079 = vmatpush.bf16.msrb.mxu2 %v1693_v7  ;;  %v1714_v7 = vld [vmem:[%s2117_s6 + $0x50] sm:$0xff] }
 0x1aa   : > { %v605_v8 = vpop.f32.mrf.mxu1 }
 0x1ab   : > { %680 = vrot.lane.b32.xlu2 %v605_v8, %s1765_s29  ;;  %v1700_v8 = vld [vmem:[%s2116_s5 + $0x70] sm:$0xff] }
 0x1b2   : > { %v608_v9 = vpop.f32.mrf.mxu1 }
 0x1b3   : > { %689 = vrot.lane.b32.xlu0 %v608_v9, %s1766_s11  ;;  %v1692_v9 = vld [vmem:[%s2116_s5 + $0x30] sm:$0xff] }
 0x1b4   : > { %1080 = vmatpush.bf16.msrb.mxu2 %v1692_v9  ;;  %v1713_v9 = vld [vmem:[%s2117_s6 + $0x48] sm:$0xff] }
 0x1ba   : > { %v610_v10 = vpop.f32.mrf.mxu1 }
 0x1bb   : > { %691 = vrot.lane.b32.xlu1 %v610_v10, %s1766_s11 }
 0x1c2   : > { %v613_v18 = vpop.f32.mrf.mxu1 }
 0x1c3   : > { %698 = vst.msk [vmem:[#allocation2 + $0x8] sm:$0xff] %vm618_vm4, %v613_v18 }
 0x1ca   : > { %v615_v25 = vpop.f32.mrf.mxu1  ;;  %v701_v27 = vld [vmem:[#allocation2 + $0x8] sm:$0xff] }
 0x1cb   : > { %699 = vst.msk [vmem:[#allocation2 + $0x18] sm:$0xff] %vm618_vm4, %v615_v25  ;;  %v1695_v25 = vld [vmem:[%s2116_s5 + $0x48] sm:$0xff] }
 0x1cd   : > { %v646_v11 = vpop.permute.xlu2 %645 }
 0x1d2   : > { %v703_v28 = vld [vmem:[#allocation2 + $0x18] sm:$0xff] }
 0x1d3   : > { %v705_v30 = vpack.c.bf16 %v703_v28, %v701_v27  ;;  %v1694_v27 = vld [vmem:[%s2116_s5 + $0x40] sm:$0xff] }
 0x1d4   : > { %v1702_v28 = vld [vmem:[%s2116_s5 + $0x80] sm:$0xff] }
 0x1d5   : > { %v635_v12 = vpop.permute.xlu1 %634  ;;  %v648_v15 = vpop.permute.xlu2 %647  ;;  %1508 = vmatmul.msk.bf16.vlgmr.msra.gmra.mxu3 %vm618_vm4, %v705_v30  ;;  %1112 = vmatpush.bf16.msra.mxu0 %v1702_v28 }
 0x1dd   : > { %v637_v16 = vpop.permute.xlu1 %636 }
 0x1e5   : > { %v624_v13 = vpop.permute.xlu0 %623 }
 0x1e6   : > { %630 = vst.msk [vmem:[#allocation2] sm:$0xff] %vm629_vm5, %v624_v13  ;;  %v1690_v13 = vld [vmem:[%s2116_s5 + $0x20] sm:$0xff] }
 0x1e7   : > { %641 = vst.msk [vmem:[#allocation2] sm:$0xff] %vm640_vm6, %v635_v12  ;;  %v1699_v12 = vld [vmem:[%s2116_s5 + $0x68] sm:$0xff] }
 0x1e8   : > { %652 = vst.msk [vmem:[#allocation2] sm:$0xff] %vm651_vm7, %v646_v11  ;;  %v1691_v11 = vld [vmem:[%s2116_s5 + $0x28] sm:$0xff] }
 0x1e9   : > { %1081 = vmatpush.bf16.msrb.mxu2 %v1691_v11  ;;  %v1712_v11 = vld [vmem:[%s2117_s6 + $0x40] sm:$0xff] }
 0x1ed   : > { %v626_v14 = vpop.permute.xlu0 %625  ;;  %v668_v19 = vpop.permute.xlu2 %667  ;;  %1082 = vmatpush.bf16.msrb.mxu2 %v1690_v13 }
 0x1ee   : > { %631 = vst.msk [vmem:[#allocation2 + $0x10] sm:$0xff] %vm629_vm5, %v626_v14  ;;  %v1698_v14 = vld [vmem:[%s2116_s5 + $0x60] sm:$0xff]  ;;  %vm1328_vm5 = vcmask 122880  }
 0x1ef   : > { %642 = vst.msk [vmem:[#allocation2 + $0x10] sm:$0xff] %vm640_vm6, %v637_v16  ;;  %v1689_v16 = vld [vmem:[%s2116_s5 + $0x18] sm:$0xff]  ;;  %vm1334_vm6 = vcmask 188544  }
 0x1f0   : > { %653 = vst.msk [vmem:[#allocation2 + $0x10] sm:$0xff] %vm651_vm7, %v648_v15 }
 0x1f1   : > { %1083 = vmatpush.bf16.msrb.mxu2 %v1689_v16 }
 0x1f5   : > { %v657_v17 = vpop.permute.xlu0 %656 }
 0x1f6   : > { %663 = vst.msk [vmem:[#allocation2] sm:$0xff] %vm662_vm8, %v657_v17  ;;  %v1697_v17 = vld [vmem:[%s2116_s5 + $0x58] sm:$0xff] }
 0x1f7   : > { %674 = vst.msk [vmem:[#allocation2] sm:$0xff] %vm673_vm9, %v668_v19  ;;  %v1688_v19 = vld [vmem:[%s2116_s5 + $0x10] sm:$0xff] }
 0x1f8   : > { %1084 = vmatpush.bf16.msrb.mxu2 %v1688_v19  ;;  %v350_v19 = vld [vmem:[%s2118_s7 + $0x6] sm:$0x1] }
 0x1fd   : > { %v659_v24 = vpop.permute.xlu1 %658 }
 0x1fe   : > { %664 = vst.msk [vmem:[#allocation2 + $0x10] sm:$0xff] %vm662_vm8, %v659_v24  ;;  %v1687_v24 = vld [vmem:[%s2116_s5 + $0x8] sm:$0xff] }
 0x1ff   : > { %1085 = vmatpush.bf16.msrb.mxu2 %v1687_v24 }
 0x203   : > { %1086 = vmatpush.bf16.msrb.mxu2 %v1686_v26 }
 0x205   : > { %v681_v33 = vpop.permute.xlu2 %680 }
 0x20d   : > { %v670_v32 = vpop.permute.xlu0 %669 }
 0x20e   : > { %675 = vst.msk [vmem:[#allocation2 + $0x10] sm:$0xff] %vm673_vm9, %v670_v32 }
 0x20f   : > { %686 = vst.msk [vmem:[#allocation2 + $0x10] sm:$0xff] %vm684_vm10, %v681_v33 }
 0x215   : > { %v679_v36 = vpop.permute.xlu1 %678 }
 0x216   : > { %685 = vst.msk [vmem:[#allocation2] sm:$0xff] %vm684_vm10, %v679_v36 }
 0x225   : > { %v690_v37 = vpop.permute.xlu0 %689 }
 0x226   : > { %696 = vst.msk [vmem:[#allocation2] sm:$0xff] %vm695_vm11, %v690_v37 }
 0x22d   : > { %v692_v38 = vpop.permute.xlu1 %691  ;;  %v700_v39 = vld [vmem:[#allocation2] sm:$0xff] }
 0x22e   : > { %697 = vst.msk [vmem:[#allocation2 + $0x10] sm:$0xff] %vm695_vm11, %v692_v38 }
 0x235   : > { %v702_v40 = vld [vmem:[#allocation2 + $0x10] sm:$0xff] }
 0x236   : > { %v704_v41 = vpack.c.bf16 %v702_v40, %v700_v39 }
 0x238   : > { %789 = vmatmul.bf16.vlgmr.msra.gmra.mxu2 %v704_v41 }
 0x258   : > { %v804_v42 = vpop.f32.mrf.mxu3 }
 0x260   : > { %v806_v48 = vpop.f32.mrf.mxu3 }
 0x2bb   : > { %v790_v43 = vpop.f32.mrf.mxu2 }
 0x2bc   : > { %v805_v44 = vadd.f32 %v804_v42, %v790_v43 }
 0x2be   : > { %v810_v46 = vmul.f32 %v1744_v45, %v805_v44 }
 0x2c0   : > { %v813_v52 = vadd.f32 %v1745_v47, %v810_v46 }
 0x2c2   : > { %v815_v54 = vmax.f32 %v813_v52, 0.0 }
 0x2c3   : > { %v792_v49 = vpop.f32.mrf.mxu2 }
 0x2c4   : > { %v807_v50 = vadd.f32 %v806_v48, %v792_v49  ;;  %v1123_v49 = vlaneseq }
 0x2c6   : > { %v811_v51 = vmul.f32 %v1744_v45, %v807_v50  ;;  %v1746_v45 = vld [vmem:[%s2118_s7 + $0x4] ss:$0 sm:$0xff]  ;;  %vm1125_vm1 = vcmp.lt.s32.totalorder %v1123_v49, 64  ;;  %vm2055_vm2 = vcmp.ge.s32.totalorder %v1123_v49, 64  ;;  %vm2059_vm3 = vcmp.lt.s32.totalorder %v1123_v49, 128 }
 0x2c8   : > { %v814_v53 = vadd.f32 %v1745_v47, %v811_v51  ;;  %v1747_v47 = vld [vmem:[%s2118_s7 + $0x5] ss:$0 sm:$0xff] }
 0x2ca   : > { %v816_v55 = vmax.f32 %v814_v53, 0.0 }
 0x2cc   : > { %v822_v56 = vpack.c.bf16 %v816_v55, %v815_v54 }
 0x2ce   : > { %852 = vmatpush.bf16.msrb.mxu3 %v822_v56 }
 0x2d1   : > { %1517 = vmatmul.msk.bf16.vlgmr.msrb.gmra.mxu3 %vm618_vm4, %v1684_v57  ;;  %v1711_v57 = vld [vmem:[%s2117_s6 + $0x38] sm:$0xff] }
 0x2d2   : > { %1092 = vmatpush.bf16.msra.mxu3 %v1701_v6  ;;  %1287 = vmatpush.bf16.msra.mxu2 %v1711_v57  ;;  %v1706_v6 = vld [vmem:[%s2117_s6 + $0x10] sm:$0xff] }
 0x2d6   : > { %1093 = vmatpush.bf16.msra.mxu3 %v1700_v8  ;;  %1288 = vmatpush.bf16.msra.mxu2 %v1710_v59  ;;  %v1705_v8 = vld [vmem:[%s2117_s6 + $0x8] sm:$0xff] }
 0x2da   : > { %1094 = vmatpush.bf16.msra.mxu3 %v1699_v12 }
 0x2de   : > { %1095 = vmatpush.bf16.msra.mxu3 %v1698_v14 }
 0x2e1   : > { %1518 = vmatmul.msk.bf16.gmra.mxu3 %vm618_vm4, %v1685_v58  ;;  %v1719_v58 = vld [vmem:[%s2117_s6 + $0x78] sm:$0xff] }
 0x2e2   : > { %1096 = vmatpush.bf16.msra.mxu3 %v1697_v17 }
 0x2e6   : > { %1097 = vmatpush.bf16.msra.mxu3 %v1696_v20 }
 0x2ea   : > { %1098 = vmatpush.bf16.msra.mxu3 %v1695_v25 }
 0x2ee   : > { %1099 = vmatpush.bf16.msra.mxu3 %v1694_v27 }
 0x2f1   : > { %1519 = vmatmul.msk.bf16.gmra.mxu3 %vm618_vm4, %v835_v61  ;;  %v1709_v61 = vld [vmem:[%s2117_s6 + $0x28] sm:$0xff]  ;;  %vm1137_vm4 = vmand %vm2055_vm2, %vm2059_vm3 }
 0x2f2   : > { %1300 = vmatpush.bf16.msrb.mxu3 %v1719_v58  ;;  %1289 = vmatpush.bf16.msra.mxu2 %v1709_v61 }
 0x2f6   : > { %1301 = vmatpush.bf16.msrb.mxu3 %v1718_v60 }
 0x354   : > { %v854_v62 = vpop.f32.mrf.mxu3 }
 0x355   : > { %869 = vst.msk [vmem:[#allocation3] sm:$0xf] %vm868_vm12, %v854_v62 }
 0x356   : > { %871 = vst.sshfl [vmem:[#allocation1] sm:$0xff pattern:$0x75316420] %v854_v62  ;;  %v1717_v62 = vld [vmem:[%s2117_s6 + $0x68] sm:$0xff] }
 0x357   : > { %1302 = vmatpush.bf16.msrb.mxu3 %v1717_v62 }
 0x35c   : > { %v856_v63 = vpop.f32.mrf.mxu3 }
 0x35d   : > { %v873_v0 = vld [vmem:[#allocation1 + $0x1] ss:$2 sm:$0xff]  ;;  %880 = vrot.lane.b32.xlu1 %v856_v63, %s1763_s27 }
 0x35e   : > { %885 = vst.sshfl [vmem:[#allocation1] sm:$0xff pattern:$0x75316420] %v856_v63  ;;  %874 = vrot.lane.b32.xlu2 %v873_v0, %s1760_s22  ;;  %v1708_v63 = vld [vmem:[%s2117_s6 + $0x20] sm:$0xff] }
 0x35f   : > { %v1716_v0 = vld [vmem:[%s2117_s6 + $0x60] sm:$0xff]  ;;  %1290 = vmatpush.bf16.msra.mxu2 %v1708_v63 }
 0x360   : > { %1303 = vmatpush.bf16.msrb.mxu3 %v1716_v0 }
 0x364   : > { %v859_v1 = vpop.f32.mrf.mxu3 }
 0x365   : > { %v887_v2 = vld [vmem:[#allocation1 + $0x1] ss:$2 sm:$0xff]  ;;  %893 = vst.msk [vmem:[#allocation3 + $0x4] sm:$0xf] %vm868_vm12, %v859_v1 }
 0x366   : > { %895 = vst.sshfl [vmem:[#allocation1] sm:$0xff pattern:$0x75316420] %v859_v1  ;;  %v1707_v1 = vld [vmem:[%s2117_s6 + $0x18] sm:$0xff] }
 0x367   : > { %1291 = vmatpush.bf16.msra.mxu2 %v1707_v1 }
 0x36b   : > { %1292 = vmatpush.bf16.msra.mxu2 %v1706_v6 }
 0x36c   : > { %v861_v3 = vpop.f32.mrf.mxu3 }
 0x36d   : > { %v897_v4 = vld [vmem:[#allocation1 + $0x1] ss:$2 sm:$0xff]  ;;  %903 = vrot.lane.b32.xlu2 %v861_v3, %s1763_s27 }
 0x36e   : > { %907 = vst.sshfl [vmem:[#allocation1] sm:$0xff pattern:$0x75316420] %v861_v3  ;;  %898 = vrot.lane.b32.xlu0 %v897_v4, %s1760_s22 }
 0x36f   : > { %1293 = vmatpush.bf16.msra.mxu2 %v1705_v8 }
 0x374   : > { %v864_v15 = vpop.f32.mrf.mxu3 }
 0x375   : > { %v909_v5 = vld [vmem:[#allocation1 + $0x1] ss:$2 sm:$0xff]  ;;  %914 = vst.msk [vmem:[#allocation3 + $0x8] sm:$0xf] %vm868_vm12, %v864_v15 }
 0x376   : > { %888 = vrot.lane.b32.xlu0 %v887_v2, %s1765_s29  ;;  %910 = vrot.lane.b32.xlu1 %v909_v5, %s1765_s29  ;;  %s339_s29 = scalar_lea.vmem %s2119_s8, %s2126_s10  ;;  %v1715_v2 = vld [vmem:[%s2117_s6 + $0x58] sm:$0xff] }
 0x377   : > { %1304 = vmatpush.bf16.msrb.mxu3 %v1715_v2  ;;  %v1748_v12 = vld [vmem:[%s339_s29] ss:$0 sm:$0xff] }
 0x37b   : > { %1305 = vmatpush.bf16.msrb.mxu3 %v1714_v7 }
 0x37c   : > { %v916_v21 = vld [vmem:[#allocation3 + $0x8] sm:$0xf]  ;;  %v866_v22 = vpop.f32.mrf.mxu3 }
 0x37d   : > { %921 = vst [vmem:[#allocation1 + $0x10] ss:$2 sm:$0xff] %v916_v21 }
 0x37e   : > { %1319 = vrot.lane.b32.xlu1 %v1748_v12, %s1767_s17 }
 0x37f   : > { %1306 = vmatpush.bf16.msrb.mxu3 %v1713_v9 }
 0x383   : > { %1307 = vmatpush.bf16.msrb.mxu3 %v1712_v11 }
 0x384   : > { %v924_v29 = vld.sshfl [vmem:[#allocation1 + $0x10] sm:$0xff pattern:$0x75316420] }
 0x385   : > { %v930_v30 = vpack.c.bf16 %v924_v29, %v924_v29 }
 0x387   : > { %1592 = vmatmul.msk.bf16.vlgmr.msra.gmra.mxu0 %vm1075_vm15, %v930_v30 }
 0x3b8   : > { %v875_v10 = vpop.permute.xlu2 %874 }
 0x3b9   : > { %878 = vst.msk [vmem:[#allocation3] sm:$0xf] %vm877_vm13, %v875_v10  ;;  %v1704_v10 = vld [vmem:[%s2117_s6] sm:$0xff] }
 0x3ba   : > { %1294 = vmatpush.bf16.msra.mxu2 %v1704_v10 }
 0x3c7   : > { %v904_v32 = vpop.permute.xlu2 %903 }
 0x3cf   : > { %v881_v18 = vpop.permute.xlu1 %880 }
 0x3d0   : > { %884 = vst.msk [vmem:[#allocation3] sm:$0xf] %vm883_vm14, %v881_v18 }
 0x3e0   : > { %v899_v31 = vpop.permute.xlu0 %898 }
 0x3e1   : > { %901 = vst.msk [vmem:[#allocation3 + $0x4] sm:$0xf] %vm877_vm13, %v899_v31 }
 0x3e2   : > { %906 = vst.msk [vmem:[#allocation3 + $0x4] sm:$0xf] %vm883_vm14, %v904_v32 }
 0x3e8   : > { %v889_v33 = vpop.permute.xlu0 %888  ;;  %v911_v34 = vpop.permute.xlu1 %910 }
 0x3e9   : > { %892 = vst.msk [vmem:[#allocation3] sm:$0xf] %vm891_vm0, %v889_v33 }
 0x3ea   : > { %913 = vst.msk [vmem:[#allocation3 + $0x4] sm:$0xf] %vm891_vm0, %v911_v34 }
 0x3f0   : > { %v1320_v28 = vpop.permute.xlu1 %1319 }
 0x3f1   : > { %v915_v35 = vld [vmem:[#allocation3] sm:$0xff] }
 0x3f2   : > { %919 = vst [vmem:[#allocation1] ss:$2 sm:$0xff] %v915_v35 }
 0x3f9   : > { %v922_v36 = vld.sshfl [vmem:[#allocation1] sm:$0xff pattern:$0x75316420]  ;;  %v923_v37 = vld.sshfl [vmem:[#allocation1 + $0x8] sm:$0xff pattern:$0x75316420] }
 0x3fa   : > { %v928_v38 = vpack.c.bf16 %v922_v36, %v922_v36  ;;  %v929_v39 = vpack.c.bf16 %v923_v37, %v923_v37 }
 0x3fc   : > { %1087 = vmatmul.bf16.vlgmr.msrb.gmra.mxu2 %v928_v38  ;;  %1100 = vmatmul.bf16.vlgmr.msra.gmra.mxu3 %v929_v39 }
 0x404   : > { %v1114_v40 = vpop.f32.mrf.mxu0 }
 0x40c   : > { %v1116_v41 = vpop.f32.mrf.mxu0 }
 0x47f   : > { %v1088_v42 = vpop.f32.mrf.mxu2  ;;  %v1101_v43 = vpop.f32.mrf.mxu3 }
 0x480   : > { %v1102_v44 = vadd.f32 %v1101_v43, %v1088_v42 }
 0x482   : > { %v1115_v46 = vadd.f32 %v1114_v40, %v1102_v44 }
 0x484   : > { %v1119_v48 = vmul.f32 %v1746_v45, %v1115_v46 }
 0x486   : > { %v1121_v50 = vadd.f32 %v1747_v47, %v1119_v48 }
 0x487   : > { %v1090_v51 = vpop.f32.mrf.mxu2  ;;  %v1103_v52 = vpop.f32.mrf.mxu3 }
 0x488   : > { %v1122_v53 = vmax.f32 %v1121_v50, 0.0 }
 0x48a   : > { %1129 = vst [vmem:[#allocation1] sm:$0xff] %v1122_v53 }
 0x48b   : > { %1127 = vst.msk [vmem:[#allocation4] sm:$0x1] %vm1125_vm1, %v1122_v53 }
 0x491   : > { %v1131_v54 = vld [vmem:[#allocation1 + $0x1] ss:$9 sm:$0xff] }
 0x492   : > { %1132 = vrot.lane.b32.xlu2 %v1131_v54, %s1763_s27  ;;  %1139 = vst [vmem:[#allocation1] sm:$0xff] %v1122_v53 }
 0x499   : > { %v1141_v55 = vld [vmem:[#allocation1 + $0x2] ss:$9 sm:$0xff] }
 0x49a   : > { %1144 = vst [vmem:[#allocation1] sm:$0xff] %v1122_v53 }
 0x49b   : > { %1143 = vst.msk [vmem:[#allocation4 + $0x1] sm:$0x1] %vm1125_vm1, %v1141_v55 }
 0x4a1   : > { %v1146_v56 = vld [vmem:[#allocation1 + $0x3] ss:$9 sm:$0xff] }
 0x4a2   : > { %1147 = vrot.lane.b32.xlu0 %v1146_v56, %s1763_s27 }
 0x4ec   : > { %v1133_v5 = vpop.permute.xlu2 %1132 }
 0x4ed   : > { %1138 = vst.msk [vmem:[#allocation4] sm:$0x1] %vm1137_vm4, %v1133_v5 }
 0x514   : > { %v1148_v13 = vpop.permute.xlu0 %1147 }
 0x515   : > { %1150 = vst.msk [vmem:[#allocation4 + $0x1] sm:$0x1] %vm1137_vm4, %v1148_v13 }
 0x51c   : > { %v1151_v14 = vld [vmem:[#allocation4] sm:$0x3] }
 0x51d   : > { %v1153_v15 = vperm.slane %v1151_v14, 0  ;;  %v1154_v16 = vperm.slane %v1151_v14, 1 }
 0x51f   : > { %v1157_v17 = vpack.c.bf16 %v1153_v15, %v1153_v15  ;;  %v1158_v18 = vpack.c.bf16 %v1154_v16, %v1154_v16 }
 0x521   : > { %1295 = vmatmul.bf16.vlgmr.msra.gmra.mxu2 %v1157_v17  ;;  %1308 = vmatmul.bf16.vlgmr.msrb.gmra.mxu3 %v1158_v18 }
 0x5a4   : > { %v1296_v20 = vpop.f32.mrf.mxu2  ;;  %v1309_v21 = vpop.f32.mrf.mxu3 }
 0x5a5   : > { %v1297_v22 = vadd.f32 %v1296_v20, %v350_v19 }
 0x5a7   : > { %v1310_v23 = vadd.f32 %v1309_v21, %v1297_v22 }
 0x5a9   : > { %v1313_v24 = vmul.f32 0.5, %v1310_v23  ;;  %1329 = vst.msk [vmem:[%s342_s21] sm:$0x1] %vm1328_vm5, %v1310_v23 }
 0x5ab   : > { %v1314_v25 = vmul.f32 1.442695, %v1313_v24 }
 0x5ac   : > { %v1298_v26 = vpop.f32.mrf.mxu2  ;;  %v1311_v27 = vpop.f32.mrf.mxu3 }
 0x5ad   : > { %1749 = vpow2.f32 %v1314_v25 }
 0x5b3   : > { %v1750_v29 = vpop.eup %1749 }
 0x5b4   : > { %v1322_v30 = vmul.f32 %v1750_v29, %v1320_v28 }
 0x5b6   : > { %1324 = vrot.lane.b32.xlu2 %v1322_v30, %s1768_s23 }
 0x610   : > { %v1325_v31 = vpop.permute.xlu2 %1324 }
 0x611   : > { %v1327_v32 = vadd.f32 %v1325_v31, %v1310_v23 }
 0x613   : > { %1331 = vrot.lane.b32.xlu0 %v1327_v32, %s1762_s24 }
 0x685   : > { %v1332_v33 = vpop.permute.xlu0 %1331 }
 0x686   : > { %1335 = vst.msk [vmem:[%s342_s21] sm:$0x1] %vm1334_vm6, %v1332_v33 }
 0x687 PF: > { %s19_s30 = sadd.s32 1, %s1757_s30  }
 0x688   : > { %p16_p4 = scmp.ge.s32.totalorder %s19_s30, 4  }
 0x68a   :  { %18 = sbr.rel (!%p16_p4) target bundleno = 1 (0x1), region = 97 }

</bundles_post_ra>
